<compile_context>
chip_gen: v7x
topology: tpu7x:2x2x1
jax: 0.10.0
libtpu: 0.0.40
codegen_flags: <defaults>
</compile_context>

<pallas_src>
import functools

import jax
import jax.numpy as jnp
from jax.experimental import pallas as pl
from jax.experimental.pallas import tpu as pltpu


def _round_up(x: int, m: int) -> int:
    return ((x + m - 1) // m) * m


def _sigmoid_f32(z):
    # exp -> EUP slot; approx reciprocal stays off the VALU.
    e = jnp.exp(-z)
    return pl.reciprocal(1.0 + e, approx=True)


def mlp_kernel(x_ref, w1_ref, b1_ref, wh_ref, bh_ref, w2_ref, b2_ref, o_ref,
               *, num_hidden: int):
    # linear1 + sigmoid.  x tile: (TB, D_in) f32 -> bf16 operand; w1: (D_in, H_p) bf16.
    h = jnp.dot(x_ref[...].astype(jnp.bfloat16), w1_ref[...],
                preferred_element_type=jnp.float32)
    h = _sigmoid_f32(h + b1_ref[...])
    # (nbcouche - 1) hidden Linear(H, H) layers, each followed by sigmoid.
    # L is tiny for CartPole -> static unroll is fine.
    for n in range(num_hidden):
        h = jnp.dot(h.astype(jnp.bfloat16), wh_ref[n],
                    preferred_element_type=jnp.float32)
        h = _sigmoid_f32(h + bh_ref[n])
    # linear2 (no activation)
    out = jnp.dot(h.astype(jnp.bfloat16), w2_ref[...],
                  preferred_element_type=jnp.float32)
    o_ref[...] = out + b2_ref[...]


def prepare_params(w1, b1, wh, bh, w2, b2):
    """One-time prep: pad feature dims to lane width (128), cast weights to bf16.

    The padded / cast parameters live in HBM once; per-step forward calls only
    run the pallas_call (no re-padding of weights every invocation).
    """
    D_in, H = w1.shape
    D_out = w2.shape[1]
    L = wh.shape[0]                      # number of hidden (H,H) layers actually used
    Lp = max(L, 1)                       # keep a non-empty stacked array for the kernel

    LANE = 128
    H_p = _round_up(H, LANE)
    D_out_p = _round_up(D_out, LANE)

    f32, bf16 = jnp.float32, jnp.bfloat16
    w1p = jnp.zeros((D_in, H_p), bf16).at[:, :H].set(w1.astype(bf16))
    b1p = jnp.zeros((1, H_p), f32).at[:, :H].set(b1.astype(f32))
    whp = jnp.zeros((Lp, H_p, H_p), bf16).at[:L, :H, :H].set(wh.astype(bf16))
    bhp = jnp.zeros((Lp, 1, H_p), f32).at[:L, :, :H].set(bh.astype(f32))
    w2p = jnp.zeros((H_p, D_out_p), bf16).at[:H, :D_out].set(w2.astype(bf16))
    b2p = jnp.zeros((1, D_out_p), f32).at[:, :D_out].set(b2.astype(f32))

    return dict(w1=w1p, b1=b1p, wh=whp, bh=bhp, w2=w2p, b2=b2p,
                num_hidden=L, d_in=D_in, d_out=D_out)


def _choose_tiling(B: int, block_b: int):
    """Pick (TB, num_tiles) minimizing batch padding; >= 2 tiles when B > 8 so
    the 'parallel' batch axis can shard across both v7x TensorCores."""
    if B <= 8:
        return _round_up(B, 8), 1
    num_tiles = max(-(-B // block_b), 2)
    TB = _round_up(-(-B // num_tiles), 8)
    return TB, num_tiles


def multiple_layer_forward(x, params, *, block_b: int = 1024):
    """Batched MLP forward using padded/bf16 params from prepare_params()."""
    B, D_in = x.shape
    assert D_in == params["d_in"]
    w1p, b1p = params["w1"], params["b1"]
    whp, bhp = params["wh"], params["bh"]
    w2p, b2p = params["w2"], params["b2"]
    L = params["num_hidden"]
    D_out = params["d_out"]

    H_p = w1p.shape[1]
    D_out_p = w2p.shape[1]
    Lp = whp.shape[0]

    TB, num_tiles = _choose_tiling(B, block_b)
    B_p = num_tiles * TB

    f32 = jnp.float32
    xp = x.astype(f32)
    if B_p != B:
        xp = jnp.zeros((B_p, D_in), f32).at[:B].set(xp)   # batch pad only (no 128-lane x pad)

    grid = (num_tiles,)

    flops = 2 * B_p * (D_in * H_p + L * H_p * H_p + H_p * D_out_p)
    transcendentals = B_p * H_p * (1 + L)                 # exp per sigmoid lane
    bytes_accessed = (4 * (xp.size + b1p.size + bhp.size + b2p.size + B_p * D_out_p)
                      + 2 * (w1p.size + whp.size + w2p.size))

    # NOTE: weights/biases use constant index_maps -> DMA'd into VMEM once and
    # resident across grid steps.  pipeline_mode=pl.Buffered(1) on them only
    # matters if H_p/L grow large enough to pressure VMEM (not at these sizes).
    out_p = pl.pallas_call(
        functools.partial(mlp_kernel, num_hidden=L),
        out_shape=jax.ShapeDtypeStruct((B_p, D_out_p), f32),
        grid=grid,
        in_specs=[
            pl.BlockSpec((TB, D_in), lambda i: (i, 0)),          # x: per-batch-tile, unpadded K
            pl.BlockSpec((D_in, H_p), lambda i: (0, 0)),         # weights: VMEM-resident
            pl.BlockSpec((1, H_p), lambda i: (0, 0)),
            pl.BlockSpec((Lp, H_p, H_p), lambda i: (0, 0, 0)),
            pl.BlockSpec((Lp, 1, H_p), lambda i: (0, 0, 0)),
            pl.BlockSpec((H_p, D_out_p), lambda i: (0, 0)),
            pl.BlockSpec((1, D_out_p), lambda i: (0, 0)),
        ],
        out_specs=pl.BlockSpec((TB, D_out_p), lambda i: (i, 0)),
        compiler_params=pltpu.CompilerParams(
            dimension_semantics=("parallel",),                   # shards across 2 TCs on v7x
        ),
        cost_estimate=pl.CostEstimate(
            flops=flops,
            transcendentals=transcendentals,
            bytes_accessed=bytes_accessed,
        ),
    )(xp, w1p, b1p, whp, bhp, w2p, b2p)

    return out_p[:B, :D_out]


def init_params(key, D_in, H, D_out, nbcouche):
    """Deterministic init mimicking PyTorch Linear default: U(-1/sqrt(fan_in), +)."""
    L = nbcouche - 1  # forward() only uses nbcouche-1 hidden layers
    ks = jax.random.split(key, 6)

    def uniform(k, shape, fan_in):
        bound = 1.0 / jnp.sqrt(jnp.float32(fan_in))
        return jax.random.uniform(k, shape, jnp.float32, -bound, bound)

    w1 = uniform(ks[0], (D_in, H), D_in)        # stored as (in, out) == W^T
    b1 = uniform(ks[1], (1, H), D_in)
    if L > 0:
        wh = uniform(ks[2], (L, H, H), H)
        bh = uniform(ks[3], (L, 1, H), H)
    else:
        wh = jnp.zeros((0, H, H), jnp.float32)
        bh = jnp.zeros((0, 1, H), jnp.float32)
    w2 = uniform(ks[4], (H, D_out), H)
    b2 = uniform(ks[5], (1, D_out), H)
    return w1, b1, wh, bh, w2, b2


def reference_forward(x, w1, b1, wh, bh, w2, b2):
    h = jax.nn.sigmoid(x @ w1 + b1)
    for n in range(wh.shape[0]):
        h = jax.nn.sigmoid(h @ wh[n] + bh[n])
    return h @ w2 + b2


if __name__ == "__main__":
    # CartPole-ish sizes: obs dim 4, hidden 32, 2 actions, 3 "couches".
    B, D_in, H, D_out, nbcouche = 8, 4, 32, 2, 3

    key = jax.random.PRNGKey(0)
    kx, kp, kb = jax.random.split(key, 3)
    x = jax.random.normal(kx, (B, D_in), jnp.float32)
    params = init_params(kp, D_in, H, D_out, nbcouche)
    prepared = prepare_params(*params)          # one-time pad + bf16 cast

    out = multiple_layer_forward(x, prepared)
    out = jax.block_until_ready(out)
    ref = reference_forward(x, *params)
    assert out.shape == (B, D_out)
    # bf16 matmul operands + approx-reciprocal sigmoid -> ~1e-2 relative error
    # vs. the f32 reference; tolerance relaxed accordingly.
    assert jnp.allclose(out, ref, atol=3e-2, rtol=3e-2), \
        "Pallas kernel mismatch vs JAX reference (small batch)"

    # Sanity check of the tiled / multi-grid-step + ragged-batch-pad path.
    B_big = 1000
    x_big = jax.random.normal(kb, (B_big, D_in), jnp.float32)
    out_big = jax.block_until_ready(multiple_layer_forward(x_big, prepared))
    ref_big = reference_forward(x_big, *params)
    assert out_big.shape == (B_big, D_out)
    assert jnp.allclose(out_big, ref_big, atol=3e-2, rtol=3e-2), \
        "Pallas kernel mismatch vs JAX reference (batched/tiled)"

    print("KERNEL_OK")
</pallas_src>

<mosaic_0001>
module attributes {stable_mosaic.version = 11 : i64} {
  func.func @mlp_kernel(%arg0: i32, %arg1: memref<8x4xf32, #tpu.memory_space<vmem>>, %arg2: memref<4x128xbf16, #tpu.memory_space<vmem>>, %arg3: memref<1x128xf32, #tpu.memory_space<vmem>>, %arg4: memref<2x128x128xbf16, #tpu.memory_space<vmem>>, %arg5: memref<2x1x128xf32, #tpu.memory_space<vmem>>, %arg6: memref<128x128xbf16, #tpu.memory_space<vmem>>, %arg7: memref<1x128xf32, #tpu.memory_space<vmem>>, %arg8: memref<8x128xf32, #tpu.memory_space<vmem>>) attributes {dimension_semantics = [#tpu.dimension_semantics<parallel>], iteration_bounds = array<i64: 1>, scalar_prefetch = 0 : i64, scratch_operands = 0 : i64, tpu.core_type = #tpu.core_type<tc>, window_params = [{transform_indices = @transform_0, window_bounds = array<i64: 8, 4>}, {pipeline_mode = #tpu.pipeline_mode<synchronous>, transform_indices = @transform_1, window_bounds = array<i64: 4, 128>}, {pipeline_mode = #tpu.pipeline_mode<synchronous>, transform_indices = @transform_2, window_bounds = array<i64: 1, 128>}, {pipeline_mode = #tpu.pipeline_mode<synchronous>, transform_indices = @transform_3, window_bounds = array<i64: 2, 128, 128>}, {pipeline_mode = #tpu.pipeline_mode<synchronous>, transform_indices = @transform_4, window_bounds = array<i64: 2, 1, 128>}, {pipeline_mode = #tpu.pipeline_mode<synchronous>, transform_indices = @transform_5, window_bounds = array<i64: 128, 128>}, {pipeline_mode = #tpu.pipeline_mode<synchronous>, transform_indices = @transform_6, window_bounds = array<i64: 1, 128>}, {transform_indices = @transform_7, window_bounds = array<i64: 8, 128>}]} {
    %c0 = arith.constant 0 : index
    %c0_0 = arith.constant 0 : index
    %0 = vector.load %arg1[%c0, %c0_0] : memref<8x4xf32, #tpu.memory_space<vmem>>, vector<8x4xf32>
    %1 = arith.truncf %0 : vector<8x4xf32> to vector<8x4xbf16>
    %c0_1 = arith.constant 0 : index
    %c0_2 = arith.constant 0 : index
    %2 = vector.load %arg2[%c0_1, %c0_2] : memref<4x128xbf16, #tpu.memory_space<vmem>>, vector<4x128xbf16>
    %cst = arith.constant dense<0.000000e+00> : vector<8x128xf32>
    %3 = tpu.matmul %1, %2, %cst {dimension_numbers = #tpu.dot_dimension_numbers<[1], [0], [0], [1], [0, 0, 1, 1], [], []>} : vector<8x4xbf16>, vector<4x128xbf16>, vector<8x128xf32> -> vector<8x128xf32>
    %c0_3 = arith.constant 0 : index
    %c0_4 = arith.constant 0 : index
    %4 = vector.load %arg3[%c0_3, %c0_4] : memref<1x128xf32, #tpu.memory_space<vmem>>, vector<1x128xf32>
    %5 = vector.broadcast %4 : vector<1x128xf32> to vector<8x128xf32>
    %6 = arith.addf %3, %5 : vector<8x128xf32>
    %cst_5 = arith.constant 0.000000e+00 : f32
    %7 = vector.broadcast %cst_5 : f32 to vector<8x128xf32>
    %8 = arith.subf %7, %6 : vector<8x128xf32>
    %9 = math.exp %8 : vector<8x128xf32>
    %cst_6 = arith.constant 1.000000e+00 : f32
    %10 = vector.broadcast %cst_6 : f32 to vector<8x128xf32>
    %11 = arith.addf %10, %9 : vector<8x128xf32>
    %12 = tpu.reciprocal %11 {approx = true} : vector<8x128xf32> -> vector<8x128xf32>
    %13 = arith.truncf %12 : vector<8x128xf32> to vector<8x128xbf16>
    %c0_7 = arith.constant 0 : index
    %c0_8 = arith.constant 0 : index
    %c0_9 = arith.constant 0 : index
    %14 = vector.load %arg4[%c0_7, %c0_8, %c0_9] : memref<2x128x128xbf16, #tpu.memory_space<vmem>>, vector<1x128x128xbf16>
    %15 = vector.shape_cast %14 : vector<1x128x128xbf16> to vector<128x128xbf16>
    %cst_10 = arith.constant dense<0.000000e+00> : vector<8x128xf32>
    %16 = tpu.matmul %13, %15, %cst_10 {dimension_numbers = #tpu.dot_dimension_numbers<[1], [0], [0], [1], [0, 0, 1, 1], [], []>} : vector<8x128xbf16>, vector<128x128xbf16>, vector<8x128xf32> -> vector<8x128xf32>
    %c0_11 = arith.constant 0 : index
    %c0_12 = arith.constant 0 : index
    %c0_13 = arith.constant 0 : index
    %17 = vector.load %arg5[%c0_11, %c0_12, %c0_13] : memref<2x1x128xf32, #tpu.memory_space<vmem>>, vector<1x1x128xf32>
    %18 = vector.shape_cast %17 : vector<1x1x128xf32> to vector<1x128xf32>
    %19 = vector.broadcast %18 : vector<1x128xf32> to vector<8x128xf32>
    %20 = arith.addf %16, %19 : vector<8x128xf32>
    %cst_14 = arith.constant 0.000000e+00 : f32
    %21 = vector.broadcast %cst_14 : f32 to vector<8x128xf32>
    %22 = arith.subf %21, %20 : vector<8x128xf32>
    %23 = math.exp %22 : vector<8x128xf32>
    %cst_15 = arith.constant 1.000000e+00 : f32
    %24 = vector.broadcast %cst_15 : f32 to vector<8x128xf32>
    %25 = arith.addf %24, %23 : vector<8x128xf32>
    %26 = tpu.reciprocal %25 {approx = true} : vector<8x128xf32> -> vector<8x128xf32>
    %27 = arith.truncf %26 : vector<8x128xf32> to vector<8x128xbf16>
    %c1 = arith.constant 1 : index
    %c0_16 = arith.constant 0 : index
    %c0_17 = arith.constant 0 : index
    %28 = vector.load %arg4[%c1, %c0_16, %c0_17] : memref<2x128x128xbf16, #tpu.memory_space<vmem>>, vector<1x128x128xbf16>
    %29 = vector.shape_cast %28 : vector<1x128x128xbf16> to vector<128x128xbf16>
    %cst_18 = arith.constant dense<0.000000e+00> : vector<8x128xf32>
    %30 = tpu.matmul %27, %29, %cst_18 {dimension_numbers = #tpu.dot_dimension_numbers<[1], [0], [0], [1], [0, 0, 1, 1], [], []>} : vector<8x128xbf16>, vector<128x128xbf16>, vector<8x128xf32> -> vector<8x128xf32>
    %c1_19 = arith.constant 1 : index
    %c0_20 = arith.constant 0 : index
    %c0_21 = arith.constant 0 : index
    %31 = vector.load %arg5[%c1_19, %c0_20, %c0_21] : memref<2x1x128xf32, #tpu.memory_space<vmem>>, vector<1x1x128xf32>
    %32 = vector.shape_cast %31 : vector<1x1x128xf32> to vector<1x128xf32>
    %33 = vector.broadcast %32 : vector<1x128xf32> to vector<8x128xf32>
    %34 = arith.addf %30, %33 : vector<8x128xf32>
    %cst_22 = arith.constant 0.000000e+00 : f32
    %35 = vector.broadcast %cst_22 : f32 to vector<8x128xf32>
    %36 = arith.subf %35, %34 : vector<8x128xf32>
    %37 = math.exp %36 : vector<8x128xf32>
    %cst_23 = arith.constant 1.000000e+00 : f32
    %38 = vector.broadcast %cst_23 : f32 to vector<8x128xf32>
    %39 = arith.addf %38, %37 : vector<8x128xf32>
    %40 = tpu.reciprocal %39 {approx = true} : vector<8x128xf32> -> vector<8x128xf32>
    %41 = arith.truncf %40 : vector<8x128xf32> to vector<8x128xbf16>
    %c0_24 = arith.constant 0 : index
    %c0_25 = arith.constant 0 : index
    %42 = vector.load %arg6[%c0_24, %c0_25] : memref<128x128xbf16, #tpu.memory_space<vmem>>, vector<128x128xbf16>
    %cst_26 = arith.constant dense<0.000000e+00> : vector<8x128xf32>
    %43 = tpu.matmul %41, %42, %cst_26 {dimension_numbers = #tpu.dot_dimension_numbers<[1], [0], [0], [1], [0, 0, 1, 1], [], []>} : vector<8x128xbf16>, vector<128x128xbf16>, vector<8x128xf32> -> vector<8x128xf32>
    %c0_27 = arith.constant 0 : index
    %c0_28 = arith.constant 0 : index
    %44 = vector.load %arg7[%c0_27, %c0_28] : memref<1x128xf32, #tpu.memory_space<vmem>>, vector<1x128xf32>
    %45 = vector.broadcast %44 : vector<1x128xf32> to vector<8x128xf32>
    %46 = arith.addf %43, %45 : vector<8x128xf32>
    %c0_29 = arith.constant 0 : index
    %c0_30 = arith.constant 0 : index
    %47 = vector.load %arg8[%c0_29, %c0_30] : memref<8x128xf32, #tpu.memory_space<vmem>>, vector<8x128xf32>
    tpu.vector_store %arg8[%c0_29, %c0_30], %46 {strides = array<i32>} : memref<8x128xf32, #tpu.memory_space<vmem>>, vector<8x128xf32>,
    return
  }
  func.func @transform_0(%arg0: i32) -> (i32, i32) {
    %c0_i32 = arith.constant 0 : i32
    %c0_i32_0 = arith.constant 0 : i32
    return %arg0, %c0_i32 : i32, i32
  }
  func.func @transform_1(%arg0: i32) -> (i32, i32) {
    %c0_i32 = arith.constant 0 : i32
    %c0_i32_0 = arith.constant 0 : i32
    %c0_i32_1 = arith.constant 0 : i32
    return %c0_i32, %c0_i32_0 : i32, i32
  }
  func.func @transform_2(%arg0: i32) -> (i32, i32) {
    %c0_i32 = arith.constant 0 : i32
    %c0_i32_0 = arith.constant 0 : i32
    %c0_i32_1 = arith.constant 0 : i32
    return %c0_i32, %c0_i32_0 : i32, i32
  }
  func.func @transform_3(%arg0: i32) -> (i32, i32, i32) {
    %c0_i32 = arith.constant 0 : i32
    %c0_i32_0 = arith.constant 0 : i32
    %c0_i32_1 = arith.constant 0 : i32
    %c0_i32_2 = arith.constant 0 : i32
    return %c0_i32, %c0_i32_0, %c0_i32_1 : i32, i32, i32
  }
  func.func @transform_4(%arg0: i32) -> (i32, i32, i32) {
    %c0_i32 = arith.constant 0 : i32
    %c0_i32_0 = arith.constant 0 : i32
    %c0_i32_1 = arith.constant 0 : i32
    %c0_i32_2 = arith.constant 0 : i32
    return %c0_i32, %c0_i32_0, %c0_i32_1 : i32, i32, i32
  }
  func.func @transform_5(%arg0: i32) -> (i32, i32) {
    %c0_i32 = arith.constant 0 : i32
    %c0_i32_0 = arith.constant 0 : i32
    %c0_i32_1 = arith.constant 0 : i32
    return %c0_i32, %c0_i32_0 : i32, i32
  }
  func.func @transform_6(%arg0: i32) -> (i32, i32) {
    %c0_i32 = arith.constant 0 : i32
    %c0_i32_0 = arith.constant 0 : i32
    %c0_i32_1 = arith.constant 0 : i32
    return %c0_i32, %c0_i32_0 : i32, i32
  }
  func.func @transform_7(%arg0: i32) -> (i32, i32) {
    %c0_i32 = arith.constant 0 : i32
    %c0_i32_0 = arith.constant 0 : i32
    return %arg0, %c0_i32 : i32, i32
  }
}

</mosaic_0001>

<bundles_post_ra>
// kernel: tpu_custom_call.1
= control target key start
LH: loop header
LB: loop body
LE: loop exit
PB: predicated region body
PF: predicated region fallthrough
CT: control target
= control target key end

     0   :  { %12 = vsyncpa [#allocation3], 0  ;;  %s858_s0 = inlined_call_operand.vmem [shape: f32[8,4], index: 0, kind: input, shape index: {}]   ;;  %s859_s1 = inlined_call_operand.vmem [shape: bf16[4,128], index: 1, kind: input, shape index: {}]   ;;  %s860_s2 = inlined_call_operand.vmem [shape: f32[1,128], index: 2, kind: input, shape index: {}]   ;;  %s861_s3 = inlined_call_operand.hbm [shape: bf16[2,128,128], index: 3, kind: input, shape index: {}]   ;;  %s862_s4 = inlined_call_operand.vmem [shape: f32[2,1,128], index: 4, kind: input, shape index: {}]   ;;  %s863_s5 = inlined_call_operand.hbm [shape: bf16[128,128], index: 5, kind: input, shape index: {}]   ;;  %s864_s6 = inlined_call_operand.vmem [shape: f32[1,128], index: 6, kind: input, shape index: {}]   ;;  %s865_s7 = inlined_call_operand.hbm [shape: f32[8,128], index: 7, kind: output, shape index: {}]  }
   0x1   :  { %13 = vsyncpa [#allocation6], 0 }
   0x2   :  { %14 = vsyncpa [#allocation4], 0  ;;  %s724_s24 = smov [#allocation2]   ;;  %s652_s28 = scalar_lea.hbm %s861_s3, 2048 }
   0x3   :  { %s26_s25 = sshll.u32 %s724_s24, 4  ;;  %p653_p0 = scmp.ne.s32.totalorder %s861_s3, %s652_s28  ;;  %s27_s25 = int_to_ptr.vmem [resolvable:$true] %s26_s25 }
   0x4   :  { %p656_p1 = scmp.lt.u32.totalorder %s652_s28, %s861_s3 }
   0x6   :  { %p658_p2 = pnand %p656_p1, %p653_p0 }
   0x8   :  { %661 = shalt.err (!%p658_p2)
}
   0x9   :  { %s662_s10 = scalar_lea.vmem %s27_s25, 2048  ;;  %p667_p4 = scmp.lt.s32.totalorder %s27_s25, %s27_s25 }
   0xa   :  { %p663_p3 = scmp.ne.s32.totalorder %s27_s25, %s662_s10  ;;  %p668_p5 = scmp.lt.s32.totalorder %s662_s10, %s662_s10 }
   0xc   :  { %p669_p6 = por %p668_p5, %p667_p4 }
   0xe   :  { %p670_p7 = pnand %p669_p6, %p663_p3 }
  0x10   :  { %673 = shalt.err (!%p670_p7)
}
  0x11   :  { %s725_s11 = smov 64   ;;  %s726_s12 = smov 4  }
  0x12   :  { %32 = dma.hbm_to_vmem [thread:$0]  %s861_s3, 2048, %s27_s25, [#allocation3], %s725_s11, %s725_s11, %s726_s12  }
  0x13   :  { %s727_s15 = smov [#allocation5]   ;;  %s674_s19 = scalar_lea.hbm %s863_s5, 1024 }
  0x14   :  { %s40_s16 = sshll.u32 %s727_s15, 4  ;;  %p675_p8 = scmp.ne.s32.totalorder %s863_s5, %s674_s19  ;;  %s41_s16 = int_to_ptr.vmem [resolvable:$true] %s40_s16 }
  0x15   :  { %p678_p9 = scmp.lt.u32.totalorder %s674_s19, %s863_s5 }
  0x17   :  { %p680_p10 = pnand %p678_p9, %p675_p8 }
  0x19   :  { %683 = shalt.err (!%p680_p10)
}
  0x1a   :  { %s684_s24 = scalar_lea.vmem %s41_s16, 1024  ;;  %p689_p12 = scmp.lt.s32.totalorder %s41_s16, %s41_s16 }
  0x1b   :  { %p685_p11 = scmp.ne.s32.totalorder %s41_s16, %s684_s24  ;;  %p690_p13 = scmp.lt.s32.totalorder %s684_s24, %s684_s24 }
  0x1d   :  { %p691_p0 = por %p690_p13, %p689_p12 }
  0x1f   :  { %p692_p1 = pnand %p691_p0, %p685_p11 }
  0x21   :  { %695 = shalt.err (!%p692_p1)
}
  0x22   :  { %46 = dma.hbm_to_vmem [thread:$0]  %s863_s5, 1024, %s41_s16, [#allocation6], %s725_s11, %s725_s11, %s726_s12  }
  0x23   :  { %718 = dma.done.wait [#allocation3], 2048  }
  0x24   :  { %719 = vsyncadd [#allocation3], 4294965248 }
  0x25   :  { %720 = dma.done.wait [#allocation6], 1024  }
  0x26   :  { %721 = vsyncadd [#allocation6], 4294966272  ;;  %v728_v0 = vmov 0.0   ;;  %vm729_vm0 = vmmov 0   ;;  %vm70_vm1 = vcmask 1041408   ;;  %v56_v2 = vld [vmem:[%s858_s0] sm:$0xff] }
  0x27   :  { %543 = vmatprep.subr.bf16.mxu0 %v728_v0  ;;  %545 = vmatprep.mubr.msk.bf16.mxu0 %vm729_vm0, %v728_v0  ;;  %v58_v1 = vld [vmem:[%s859_s1] sm:$0x3]  ;;  %v57_v4 = vpack.c.bf16 %v56_v2, %v56_v2  ;;  %vm66_vm2 = vcmask 31744   ;;  %v617_v6 = vld [vmem:[#allocation2 + $0x8] sm:$0xff]   ;;  %v618_v7 = vld [vmem:[#allocation2 + $0x10] sm:$0xff]   ;;  %s730_s11 = smov [#allocation7]  }
  0x28   :  { %549 = vmatprep.subr.bf16.mxu1 %v728_v0  ;;  %565 = vmatprep.mubr.msk.bf16.mxu1 %vm729_vm0, %v728_v0  ;;  %v72_v3 = vsel %vm70_vm1, %v58_v1, 0  ;;  %v616_v5 = vld [vmem:[#allocation2] sm:$0xff]   ;;  %v619_v8 = vld [vmem:[#allocation2 + $0x18] sm:$0xff]   ;;  %v621_v10 = vld [vmem:[#allocation2 + $0x28] sm:$0xff]  }
  0x29   :  { %544 = vmatpush3.bf16.msra.mxu0 %v72_v3  ;;  %550 = vmatpush3.bf16.msra.mxu1 %v616_v5  ;;  %v620_v9 = vld [vmem:[#allocation2 + $0x20] sm:$0xff]   ;;  %v622_v11 = vld [vmem:[#allocation2 + $0x30] sm:$0xff]   ;;  %v623_v12 = vld [vmem:[#allocation2 + $0x38] sm:$0xff]  }
  0x2a   :  { %569 = vmatprep.subr.bf16.mxu0 %v728_v0  ;;  %551 = vmatprep.subr.bf16.mxu1 %v728_v0  ;;  %v484_v13 = vld [vmem:[%s860_s2] ss:$0 sm:$0xff]  ;;  %v625_v26 = vld [vmem:[#allocation2 + $0x48] sm:$0xff]   ;;  %v626_v27 = vld [vmem:[#allocation2 + $0x50] sm:$0xff]  }
  0x2b   :  { %v624_v25 = vld [vmem:[#allocation2 + $0x40] sm:$0xff]   ;;  %v627_v28 = vld [vmem:[#allocation2 + $0x58] sm:$0xff]   ;;  %v629_v30 = vld [vmem:[#allocation2 + $0x68] sm:$0xff]  }
  0x2c   :  { %546 = vmatmul.mubr.msk.bf16.vlgmr.msra.gmra.mrb[0].mxu0 %vm66_vm2, %v57_v4  ;;  %v628_v29 = vld [vmem:[#allocation2 + $0x60] sm:$0xff]   ;;  %v630_v31 = vld [vmem:[#allocation2 + $0x70] sm:$0xff]   ;;  %v631_v32 = vld [vmem:[#allocation2 + $0x78] sm:$0xff]  }
  0x2d   :  { %585 = vmatprep.mubr.msk.bf16.mxu0 %vm729_vm0, %v728_v0  ;;  %552 = vmatpush3.bf16.msra.mxu1 %v617_v6  ;;  %v486_v33 = vld [vmem:[%s862_s4] ss:$0 sm:$0xff]  ;;  %v633_v46 = vld [vmem:[#allocation5 + $0x8] sm:$0xff]   ;;  %v634_v47 = vld [vmem:[#allocation5 + $0x10] sm:$0xff]  }
  0x2e   :  { %553 = vmatprep.subr.bf16.mxu1 %v728_v0  ;;  %570 = vmatpush3.bf16.msra.mxu0 %v624_v25  ;;  %v632_v45 = vld [vmem:[#allocation5] sm:$0xff]   ;;  %v635_v48 = vld [vmem:[#allocation5 + $0x18] sm:$0xff]   ;;  %v637_v50 = vld [vmem:[#allocation5 + $0x28] sm:$0xff]  }
  0x2f   :  { %571 = vmatprep.subr.bf16.mxu0 %v728_v0  ;;  %v636_v49 = vld [vmem:[#allocation5 + $0x20] sm:$0xff]   ;;  %v638_v51 = vld [vmem:[#allocation5 + $0x30] sm:$0xff]   ;;  %v639_v52 = vld [vmem:[#allocation5 + $0x38] sm:$0xff]  }
  0x30   :  { %v496_v53 = vld [vmem:[%s862_s4 + $0x1] ss:$0 sm:$0xff]  ;;  %s474_s4 = sshll.u32 %s730_s11, 4  ;;  %s475_s4 = int_to_ptr.vmem [resolvable:$true] %s474_s4 }
  0x31   :  { %554 = vmatpush3.bf16.msra.mxu1 %v618_v7  ;;  %s696_s12 = scalar_lea.vmem %s475_s4, 128  ;;  %p701_p3 = scmp.lt.s32.totalorder %s475_s4, %s475_s4 }
  0x32   :  { %555 = vmatprep.subr.bf16.mxu1 %v728_v0  ;;  %572 = vmatpush3.bf16.msra.mxu0 %v625_v26  ;;  %p697_p2 = scmp.ne.s32.totalorder %s475_s4, %s696_s12  ;;  %p702_p4 = scmp.lt.s32.totalorder %s696_s12, %s696_s12 }
  0x33   :  { %573 = vmatprep.subr.bf16.mxu0 %v728_v0 }
  0x34   :  { %p703_p5 = por %p702_p4, %p701_p3 }
  0x35   :  { %556 = vmatpush3.bf16.msra.mxu1 %v619_v8 }
  0x36   :  { %557 = vmatprep.subr.bf16.mxu1 %v728_v0  ;;  %574 = vmatpush3.bf16.msra.mxu0 %v626_v27  ;;  %p704_p6 = pnand %p703_p5, %p697_p2 }
  0x37   :  { %575 = vmatprep.subr.bf16.mxu0 %v728_v0 }
  0x39   :  { %558 = vmatpush3.bf16.msra.mxu1 %v620_v9 }
  0x3a   :  { %559 = vmatprep.subr.bf16.mxu1 %v728_v0  ;;  %576 = vmatpush3.bf16.msra.mxu0 %v627_v28 }
  0x3b   :  { %577 = vmatprep.subr.bf16.mxu0 %v728_v0 }
  0x3d   :  { %560 = vmatpush3.bf16.msra.mxu1 %v621_v10 }
  0x3e   :  { %561 = vmatprep.subr.bf16.mxu1 %v728_v0  ;;  %578 = vmatpush3.bf16.msra.mxu0 %v628_v29 }
  0x3f   :  { %579 = vmatprep.subr.bf16.mxu0 %v728_v0 }
  0x41   :  { %562 = vmatpush3.bf16.msra.mxu1 %v622_v11 }
  0x42   :  { %563 = vmatprep.subr.bf16.mxu1 %v728_v0  ;;  %580 = vmatpush3.bf16.msra.mxu0 %v629_v30 }
  0x43   :  { %581 = vmatprep.subr.bf16.mxu0 %v728_v0 }
  0x45   :  { %564 = vmatpush3.bf16.msra.mxu1 %v623_v12 }
  0x46   :  { %589 = vmatprep.subr.bf16.mxu1 %v728_v0  ;;  %582 = vmatpush3.bf16.msra.mxu0 %v630_v31 }
  0x47   :  { %583 = vmatprep.subr.bf16.mxu0 %v728_v0 }
  0x4a   :  { %584 = vmatpush3.bf16.msra.mxu0 %v631_v32 }
  0xff   :  { %v108_v14 = vpop.f32.mrb[0].mxu0 }
 0x100   :  { %v109_v15 = vadd.f32 %v484_v13, %v108_v14  ;;  %v547_v16 = vpop.f32.mrb[1].mxu0 }
 0x101   :  { %v111_v17 = vpop.f32.mrb[2].mxu0 }
 0x102   :  { %v114_v18 = vsub.f32 0.0, %v109_v15  ;;  %v548_v19 = vpop.f32.mrb[3].mxu0 }
 0x104   :  { %v115_v20 = vmul.f32 1.442695, %v114_v18 }
 0x106   :  { %640 = vpow2.f32 %v115_v20 }
 0x110   :  { %v641_v21 = vpop.eup %640 }
 0x111   :  { %v117_v22 = vadd.f32 1.0, %v641_v21 }
 0x113   :  { %642 = vrcp.f32 %v117_v22 }
 0x11d   :  { %v643_v23 = vpop.eup %642 }
 0x11e   :  { %v119_v24 = vpack.c.bf16 %v643_v23, %v643_v23 }
 0x120   :  { %566 = vmatmul.mubr.bf16.vlgmr.msra.gmra.mrb[0].mxu1 %v119_v24 }
 0x121   :  { %605 = vmatprep.mubr.msk.bf16.mxu1 %vm729_vm0, %v728_v0  ;;  %590 = vmatpush3.bf16.msra.mxu1 %v632_v45 }
 0x122   :  { %591 = vmatprep.subr.bf16.mxu1 %v728_v0 }
 0x125   :  { %592 = vmatpush3.bf16.msra.mxu1 %v633_v46 }
 0x126   :  { %593 = vmatprep.subr.bf16.mxu1 %v728_v0 }
 0x129   :  { %594 = vmatpush3.bf16.msra.mxu1 %v634_v47 }
 0x12a   :  { %595 = vmatprep.subr.bf16.mxu1 %v728_v0 }
 0x12d   :  { %596 = vmatpush3.bf16.msra.mxu1 %v635_v48 }
 0x12e   :  { %597 = vmatprep.subr.bf16.mxu1 %v728_v0 }
 0x131   :  { %598 = vmatpush3.bf16.msra.mxu1 %v636_v49 }
 0x132   :  { %599 = vmatprep.subr.bf16.mxu1 %v728_v0 }
 0x135   :  { %600 = vmatpush3.bf16.msra.mxu1 %v637_v50 }
 0x136   :  { %601 = vmatprep.subr.bf16.mxu1 %v728_v0 }
 0x139   :  { %602 = vmatpush3.bf16.msra.mxu1 %v638_v51 }
 0x13a   :  { %603 = vmatprep.subr.bf16.mxu1 %v728_v0  ;;  %v505_v0 = vld [vmem:[%s864_s6] ss:$0 sm:$0xff] }
 0x13d   :  { %604 = vmatpush3.bf16.msra.mxu1 %v639_v52 }
 0x1f3   :  { %v225_v34 = vpop.f32.mrb[0].mxu1 }
 0x1f4   :  { %v226_v35 = vadd.f32 %v486_v33, %v225_v34  ;;  %v567_v36 = vpop.f32.mrb[1].mxu1 }
 0x1f5   :  { %v228_v37 = vpop.f32.mrb[2].mxu1 }
 0x1f6   :  { %v231_v38 = vsub.f32 0.0, %v226_v35  ;;  %v568_v39 = vpop.f32.mrb[3].mxu1 }
 0x1f8   :  { %v232_v40 = vmul.f32 1.442695, %v231_v38 }
 0x1fa   :  { %644 = vpow2.f32 %v232_v40 }
 0x204   :  { %v645_v41 = vpop.eup %644 }
 0x205   :  { %v234_v42 = vadd.f32 1.0, %v645_v41 }
 0x207   :  { %646 = vrcp.f32 %v234_v42 }
 0x211   :  { %v647_v43 = vpop.eup %646 }
 0x212   :  { %v236_v44 = vpack.c.bf16 %v647_v43, %v647_v43 }
 0x214   :  { %586 = vmatmul.mubr.bf16.vlgmr.msra.gmra.mrb[4].mxu0 %v236_v44 }
 0x2e7   :  { %v344_v54 = vpop.f32.mrb[4].mxu0 }
 0x2e8   :  { %v345_v55 = vadd.f32 %v496_v53, %v344_v54  ;;  %v587_v56 = vpop.f32.mrb[5].mxu0 }
 0x2e9   :  { %v347_v57 = vpop.f32.mrb[6].mxu0 }
 0x2ea   :  { %v350_v58 = vsub.f32 0.0, %v345_v55  ;;  %v588_v59 = vpop.f32.mrb[7].mxu0 }
 0x2ec   :  { %v351_v60 = vmul.f32 1.442695, %v350_v58 }
 0x2ee   :  { %648 = vpow2.f32 %v351_v60 }
 0x2f8   :  { %v649_v61 = vpop.eup %648 }
 0x2f9   :  { %v353_v62 = vadd.f32 1.0, %v649_v61 }
 0x2fb   :  { %650 = vrcp.f32 %v353_v62 }
 0x305   :  { %v651_v63 = vpop.eup %650 }
 0x306   :  { %v355_v1 = vpack.c.bf16 %v651_v63, %v651_v63 }
 0x308   :  { %606 = vmatmul.mubr.bf16.vlgmr.msra.gmra.mrb[4].mxu1 %v355_v1 }
 0x3db   :  { %v461_v2 = vpop.f32.mrb[4].mxu1 }
 0x3dc   :  { %v462_v3 = vadd.f32 %v505_v0, %v461_v2  ;;  %v607_v4 = vpop.f32.mrb[5].mxu1 }
 0x3dd   :  { %v464_v5 = vpop.f32.mrb[6].mxu1 }
 0x3de   :  { %467 = vst [vmem:[#allocation7] sm:$0xff] %v462_v3  ;;  %v608_v6 = vpop.f32.mrb[7].mxu1 }
 0x3df   :  { %707 = shalt.err (!%p704_p6)
}
 0x3e0   :  { %s708_s6 = scalar_lea.hbm %s865_s7, 128 }
 0x3e1   :  { %p709_p7 = scmp.ne.s32.totalorder %s865_s7, %s708_s6  ;;  %p712_p8 = scmp.lt.u32.totalorder %s708_s6, %s865_s7 }
 0x3e3   :  { %p714_p9 = pnand %p712_p8, %p709_p7 }
 0x3e5   :  { %717 = shalt.err (!%p714_p9)
}
 0x3e6   :  { %477 = dma.vmem_to_hbm [thread:$0]  %s475_s4, 128, %s865_s7, [#allocation4]  }
 0x3e7   :  { %722 = dma.done.wait [#allocation4], 128  }
 0x3e8   :  { %723 = vsyncadd [#allocation4], 4294967168 }
 0x3e9   :  { %481 = vsyncpa [#allocation3], 1 }
 0x3ea   :  { %482 = vsyncpa [#allocation6], 1 }
 0x3eb   :  { %483 = vsyncpa [#allocation4], 1 }

</bundles_post_ra>
